<compile_context>
chip_gen: v6e
topology: v6e:2x2x1
jax: 0.10.0
libtpu: 0.0.40
codegen_flags: <defaults>
</compile_context>

<pallas_src>
from functools import partial

import jax
import jax.numpy as jnp
from jax.experimental import pallas as pl
from jax.experimental.pallas import tpu as pltpu

LANE = 128
SUB = 8
CHUNK_ROWS = 64   # 64 x 128 f32 = 8 vregs per intermediate -> lives in the vreg file


def _bce_iou_block_kernel(pred_ref, targ_ref, bce_ref, inter_ref, tot_ref, *,
                          block_rows, n_full_chunks, tail_rows, n_rows, bpc,
                          needs_mask, binary_targets):
    c = pl.program_id(0)
    b = pl.program_id(1)

    @pl.when(b == 0)
    def _():
        bce_ref[...] = jnp.zeros_like(bce_ref)
        inter_ref[...] = jnp.zeros_like(inter_ref)
        tot_ref[...] = jnp.zeros_like(tot_ref)

    # Unclamped global row offset of this block.  Redundant blocks (clamped in
    # the index_map) and the overhanging rows of the final block are zeroed by
    # the row mask in the masked path below.
    base_row = (c * bpc + b) * block_rows

    def fold(x):
        # (r, LANE) -> (SUB, LANE): reduction over whole vreg-groups, pure VPU adds.
        r = x.shape[0]
        if r % SUB:
            pad = SUB - r % SUB
            x = jnp.concatenate([x, jnp.zeros((pad, LANE), x.dtype)], axis=0)
            r += pad
        return jnp.sum(x.reshape(r // SUB, SUB, LANE), axis=0)

    def terms(p, t):
        if binary_targets:
            # Exact only for t in {0,1}: one EUP log per element instead of two.
            val = jnp.where(t > 0.5, p, 1.0 - p)
            bce = -jnp.maximum(jnp.log(val), -100.0)
        else:
            # torch.nn.BCELoss clamps each log term at -100 (so 0*log(0) -> 0).
            log_p = jnp.maximum(jnp.log(p), -100.0)
            log_1mp = jnp.maximum(jnp.log(1.0 - p), -100.0)
            bce = -(t * (log_p - log_1mp) + log_1mp)
        return bce, p * t, p + t

    def run_block(masked):
        def chunk_partials(p, t, iota, limit):
            if masked:
                valid = iota < limit
                # Mask BEFORE the logs: p = t = 0 contributes exactly 0 to all
                # three sums and discards garbage from out-of-bounds rows.
                p = jnp.where(valid, p, 0.0)
                t = jnp.where(valid, t, 0.0)
            bce, inter, tot = terms(p, t)
            return fold(bce), fold(inter), fold(tot)

        zero = jnp.zeros((SUB, LANE), jnp.float32)
        accs = (zero, zero, zero)

        if n_full_chunks:
            # Built once per block; a loop-invariant operand of the fori body.
            iota = (jax.lax.broadcasted_iota(jnp.int32, (CHUNK_ROWS, LANE), 0)
                    if masked else None)

            def body(ci, accs):
                r0 = pl.multiple_of(ci * CHUNK_ROWS, CHUNK_ROWS)
                p = pred_ref[pl.ds(r0, CHUNK_ROWS), :].astype(jnp.float32)
                t = targ_ref[pl.ds(r0, CHUNK_ROWS), :].astype(jnp.float32)
                limit = (n_rows - base_row - ci * CHUNK_ROWS) if masked else None
                db, di, dt = chunk_partials(p, t, iota, limit)
                return (accs[0] + db, accs[1] + di, accs[2] + dt)

            accs = jax.lax.fori_loop(0, n_full_chunks, body, accs)

        if tail_rows:
            r0 = n_full_chunks * CHUNK_ROWS
            p = pred_ref[pl.ds(r0, tail_rows), :].astype(jnp.float32)
            t = targ_ref[pl.ds(r0, tail_rows), :].astype(jnp.float32)
            iota = (jax.lax.broadcasted_iota(jnp.int32, (tail_rows, LANE), 0)
                    if masked else None)
            limit = (n_rows - base_row - r0) if masked else None
            db, di, dt = chunk_partials(p, t, iota, limit)
            accs = (accs[0] + db, accs[1] + di, accs[2] + dt)

        # Single VMEM read-modify-write per accumulator per block.
        bce_ref[0] += accs[0]
        inter_ref[0] += accs[1]
        tot_ref[0] += accs[2]

    if not needs_mask:
        run_block(masked=False)
    else:
        interior = base_row + block_rows <= n_rows

        @pl.when(interior)
        def _():
            run_block(masked=False)

        @pl.when(jnp.logical_not(interior))
        def _():
            run_block(masked=True)


def bce_iou_loss(pred, target, smooth=1.0, assume_binary_targets=False):
    """pred/target: same shape (NCHW), pred in (0,1). Returns scalar f32 loss."""
    # TODO(synk): per-element `weight` of nn.BCELoss is not implemented
    # (the module's default is weight=None, which this matches).
    assert pred.shape == target.shape
    n = int(pred.size)

    p = pred.reshape(-1)
    t = target.reshape(-1)

    # Copy-free lane-dense (rows, 128) view when n % 128 == 0 (common case).
    # Only non-128-aligned flat sizes take the pad-to-128 fallback (zeros
    # contribute exactly 0 to every accumulated sum; BCE mean divides by n).
    # TODO(synk): a fully copy-free path for n % 128 != 0 would need manual
    # flat DMAs via memory_space=pl.ANY plus an in-kernel relayout.
    if n % LANE:
        padn = LANE - n % LANE
        p = jnp.pad(p, (0, padn))
        t = jnp.pad(t, (0, padn))
    rows = p.shape[0] // LANE
    p = p.reshape(rows, LANE)
    t = t.reshape(rows, LANE)

    # Per-chip geometry.
    kind = jax.devices()[0].device_kind.lower()
    is_v7 = ("v7" in kind) or ("7x" in kind)
    max_block_rows = 8192 if is_v7 else 16384          # v7x: 64 MiB VMEM per TC
    vmem_limit = (40 if is_v7 else 64) * 1024 * 1024

    block_rows = min(max_block_rows, rows)
    n_blocks = -(-rows // block_rows)
    ncores = 2 if (is_v7 and n_blocks >= 2) else 1     # 2-TC split only on v7x
    bpc = -(-n_blocks // ncores)                       # blocks per core
    n_full_chunks = block_rows // CHUNK_ROWS
    tail_rows = block_rows % CHUNK_ROWS
    needs_mask = (rows % block_rows != 0) or (ncores * bpc != n_blocks)

    def in_index(c, b):
        # Clamp so redundant blocks still DMA in-bounds data; their (and the
        # final block's overhanging rows') contribution is zeroed in-kernel.
        return (jnp.minimum(c * bpc + b, n_blocks - 1), 0)

    kernel = partial(_bce_iou_block_kernel,
                     block_rows=block_rows, n_full_chunks=n_full_chunks,
                     tail_rows=tail_rows, n_rows=rows, bpc=bpc,
                     needs_mask=needs_mask,
                     binary_targets=assume_binary_targets)

    acc_shape = jax.ShapeDtypeStruct((ncores, SUB, LANE), jnp.float32)
    acc_spec = pl.BlockSpec((1, SUB, LANE), lambda c, b: (c, 0, 0))

    axis0 = pltpu.CORE_PARALLEL if ncores == 2 else pltpu.ARBITRARY

    bce_acc, inter_acc, tot_acc = pl.pallas_call(
        kernel,
        out_shape=(acc_shape, acc_shape, acc_shape),
        grid_spec=pltpu.PrefetchScalarGridSpec(
            num_scalar_prefetch=0,
            grid=(ncores, bpc),
            in_specs=[
                pl.BlockSpec((block_rows, LANE), in_index),
                pl.BlockSpec((block_rows, LANE), in_index),
            ],
            out_specs=[acc_spec, acc_spec, acc_spec],
        ),
        compiler_params=pltpu.CompilerParams(
            dimension_semantics=(axis0, pltpu.ARBITRARY),
            vmem_limit_bytes=vmem_limit),
    )(p, t)

    # Tiny finalization (a few KiB of partials) outside the kernel.
    bce_mean = jnp.sum(bce_acc) / jnp.float32(n)
    inter = jnp.sum(inter_acc)
    union = jnp.sum(tot_acc) - inter
    iou = (inter + smooth) / (union + smooth)
    return bce_mean + (1.0 - iou)


def _reference(pred, target, smooth=1.0):
    p = pred.reshape(-1).astype(jnp.float32)
    t = target.reshape(-1).astype(jnp.float32)
    log_p = jnp.maximum(jnp.log(p), -100.0)
    log_1mp = jnp.maximum(jnp.log(1.0 - p), -100.0)
    bce = jnp.mean(-(t * log_p + (1.0 - t) * log_1mp))
    inter = jnp.sum(p * t)
    union = jnp.sum(p + t) - inter
    iou = (inter + smooth) / (union + smooth)
    return bce + (1.0 - iou)


if __name__ == "__main__":
    key = jax.random.PRNGKey(0)
    k1, k2 = jax.random.split(key)
    shape = (2, 4, 16, 16)  # N, C, H, W
    pred = jax.nn.sigmoid(jax.random.normal(k1, shape, dtype=jnp.float32))
    target = (jax.random.uniform(k2, shape) > 0.5).astype(jnp.float32)

    loss = bce_iou_loss(pred, target)
    jax.block_until_ready(loss)

    ref = _reference(pred, target)
    assert jnp.allclose(loss, ref, rtol=1e-5, atol=1e-5), (loss, ref)
    print("KERNEL_OK")
</pallas_src>

<mosaic_0001>
module attributes {stable_mosaic.version = 11 : i64} {
  func.func @_bce_iou_block_kernel(%arg0: i32, %arg1: i32, %arg2: memref<16x128xf32, #tpu.memory_space<vmem>>, %arg3: memref<16x128xf32, #tpu.memory_space<vmem>>, %arg4: memref<1x8x128xf32, #tpu.memory_space<vmem>>, %arg5: memref<1x8x128xf32, #tpu.memory_space<vmem>>, %arg6: memref<1x8x128xf32, #tpu.memory_space<vmem>>) attributes {dimension_semantics = [#tpu.dimension_semantics<arbitrary>, #tpu.dimension_semantics<arbitrary>], iteration_bounds = array<i64: 1, 1>, scalar_prefetch = 0 : i64, scratch_operands = 0 : i64, tpu.core_type = #tpu.core_type<tc>, window_params = [{transform_indices = @transform_0, window_bounds = array<i64: 16, 128>}, {transform_indices = @transform_1, window_bounds = array<i64: 16, 128>}, {transform_indices = @transform_2, window_bounds = array<i64: 1, 8, 128>}, {transform_indices = @transform_3, window_bounds = array<i64: 1, 8, 128>}, {transform_indices = @transform_4, window_bounds = array<i64: 1, 8, 128>}]} {
    %c0_i32 = arith.constant 0 : i32
    %0 = arith.cmpi eq, %arg1, %c0_i32 : i32
    %1 = arith.extui %0 : i1 to i32
    %c0_i32_0 = arith.constant 0 : i32
    %2 = arith.cmpi ne, %1, %c0_i32_0 : i32
    scf.if %2 {
      %cst_29 = arith.constant 0.000000e+00 : f32
      %48 = vector.broadcast %cst_29 : f32 to vector<1x8x128xf32>
      %c0_30 = arith.constant 0 : index
      %c0_31 = arith.constant 0 : index
      %c0_32 = arith.constant 0 : index
      %49 = vector.load %arg4[%c0_30, %c0_31, %c0_32] : memref<1x8x128xf32, #tpu.memory_space<vmem>>, vector<1x8x128xf32>
      tpu.vector_store %arg4[%c0_30, %c0_31, %c0_32], %48 {strides = array<i32>} : memref<1x8x128xf32, #tpu.memory_space<vmem>>, vector<1x8x128xf32>,
      %cst_33 = arith.constant 0.000000e+00 : f32
      %50 = vector.broadcast %cst_33 : f32 to vector<1x8x128xf32>
      %c0_34 = arith.constant 0 : index
      %c0_35 = arith.constant 0 : index
      %c0_36 = arith.constant 0 : index
      %51 = vector.load %arg5[%c0_34, %c0_35, %c0_36] : memref<1x8x128xf32, #tpu.memory_space<vmem>>, vector<1x8x128xf32>
      tpu.vector_store %arg5[%c0_34, %c0_35, %c0_36], %50 {strides = array<i32>} : memref<1x8x128xf32, #tpu.memory_space<vmem>>, vector<1x8x128xf32>,
      %cst_37 = arith.constant 0.000000e+00 : f32
      %52 = vector.broadcast %cst_37 : f32 to vector<1x8x128xf32>
      %c0_38 = arith.constant 0 : index
      %c0_39 = arith.constant 0 : index
      %c0_40 = arith.constant 0 : index
      %53 = vector.load %arg6[%c0_38, %c0_39, %c0_40] : memref<1x8x128xf32, #tpu.memory_space<vmem>>, vector<1x8x128xf32>
      tpu.vector_store %arg6[%c0_38, %c0_39, %c0_40], %52 {strides = array<i32>} : memref<1x8x128xf32, #tpu.memory_space<vmem>>, vector<1x8x128xf32>,
    } else {
    }
    %cst = arith.constant 0.000000e+00 : f32
    %3 = vector.broadcast %cst : f32 to vector<8x128xf32>
    %c0 = arith.constant 0 : index
    %c0_1 = arith.constant 0 : index
    %4 = vector.load %arg2[%c0, %c0_1] : memref<16x128xf32, #tpu.memory_space<vmem>>, vector<16x128xf32>
    %c0_2 = arith.constant 0 : index
    %c0_3 = arith.constant 0 : index
    %5 = vector.load %arg3[%c0_2, %c0_3] : memref<16x128xf32, #tpu.memory_space<vmem>>, vector<16x128xf32>
    %6 = math.log %4 : vector<16x128xf32>
    %cst_4 = arith.constant -1.000000e+02 : f32
    %7 = vector.broadcast %cst_4 : f32 to vector<16x128xf32>
    %8 = arith.maximumf %6, %7 : vector<16x128xf32>
    %cst_5 = arith.constant 1.000000e+00 : f32
    %9 = vector.broadcast %cst_5 : f32 to vector<16x128xf32>
    %10 = arith.subf %9, %4 : vector<16x128xf32>
    %11 = math.log %10 : vector<16x128xf32>
    %cst_6 = arith.constant -1.000000e+02 : f32
    %12 = vector.broadcast %cst_6 : f32 to vector<16x128xf32>
    %13 = arith.maximumf %11, %12 : vector<16x128xf32>
    %14 = arith.subf %8, %13 : vector<16x128xf32>
    %15 = arith.mulf %5, %14 : vector<16x128xf32>
    %16 = arith.addf %15, %13 : vector<16x128xf32>
    %cst_7 = arith.constant 0.000000e+00 : f32
    %17 = vector.broadcast %cst_7 : f32 to vector<16x128xf32>
    %18 = arith.subf %17, %16 : vector<16x128xf32>
    %19 = arith.mulf %4, %5 : vector<16x128xf32>
    %20 = arith.addf %4, %5 : vector<16x128xf32>
    %21 = vector.shape_cast %18 : vector<16x128xf32> to vector<2x8x128xf32>
    %cst_8 = arith.constant dense<0.000000e+00> : vector<8x128xf32>
    %22 = vector.multi_reduction <add>, %21, %cst_8 [0] : vector<2x8x128xf32> to vector<8x128xf32>
    %23 = vector.shape_cast %19 : vector<16x128xf32> to vector<2x8x128xf32>
    %cst_9 = arith.constant dense<0.000000e+00> : vector<8x128xf32>
    %24 = vector.multi_reduction <add>, %23, %cst_9 [0] : vector<2x8x128xf32> to vector<8x128xf32>
    %25 = vector.shape_cast %20 : vector<16x128xf32> to vector<2x8x128xf32>
    %cst_10 = arith.constant dense<0.000000e+00> : vector<8x128xf32>
    %26 = vector.multi_reduction <add>, %25, %cst_10 [0] : vector<2x8x128xf32> to vector<8x128xf32>
    %27 = arith.addf %3, %22 : vector<8x128xf32>
    %28 = arith.addf %3, %24 : vector<8x128xf32>
    %29 = arith.addf %3, %26 : vector<8x128xf32>
    %c0_11 = arith.constant 0 : index
    %c0_12 = arith.constant 0 : index
    %c0_13 = arith.constant 0 : index
    %30 = vector.load %arg4[%c0_11, %c0_12, %c0_13] : memref<1x8x128xf32, #tpu.memory_space<vmem>>, vector<1x8x128xf32>
    %31 = vector.shape_cast %30 : vector<1x8x128xf32> to vector<8x128xf32>
    %32 = arith.addf %31, %27 : vector<8x128xf32>
    %c0_14 = arith.constant 0 : index
    %c0_15 = arith.constant 0 : index
    %c0_16 = arith.constant 0 : index
    %33 = vector.load %arg4[%c0_14, %c0_15, %c0_16] : memref<1x8x128xf32, #tpu.memory_space<vmem>>, vector<1x8x128xf32>
    %34 = vector.shape_cast %33 : vector<1x8x128xf32> to vector<8x128xf32>
    %35 = vector.shape_cast %32 : vector<8x128xf32> to vector<1x8x128xf32>
    tpu.vector_store %arg4[%c0_14, %c0_15, %c0_16], %35 {strides = array<i32>} : memref<1x8x128xf32, #tpu.memory_space<vmem>>, vector<1x8x128xf32>,
    %c0_17 = arith.constant 0 : index
    %c0_18 = arith.constant 0 : index
    %c0_19 = arith.constant 0 : index
    %36 = vector.load %arg5[%c0_17, %c0_18, %c0_19] : memref<1x8x128xf32, #tpu.memory_space<vmem>>, vector<1x8x128xf32>
    %37 = vector.shape_cast %36 : vector<1x8x128xf32> to vector<8x128xf32>
    %38 = arith.addf %37, %28 : vector<8x128xf32>
    %c0_20 = arith.constant 0 : index
    %c0_21 = arith.constant 0 : index
    %c0_22 = arith.constant 0 : index
    %39 = vector.load %arg5[%c0_20, %c0_21, %c0_22] : memref<1x8x128xf32, #tpu.memory_space<vmem>>, vector<1x8x128xf32>
    %40 = vector.shape_cast %39 : vector<1x8x128xf32> to vector<8x128xf32>
    %41 = vector.shape_cast %38 : vector<8x128xf32> to vector<1x8x128xf32>
    tpu.vector_store %arg5[%c0_20, %c0_21, %c0_22], %41 {strides = array<i32>} : memref<1x8x128xf32, #tpu.memory_space<vmem>>, vector<1x8x128xf32>,
    %c0_23 = arith.constant 0 : index
    %c0_24 = arith.constant 0 : index
    %c0_25 = arith.constant 0 : index
    %42 = vector.load %arg6[%c0_23, %c0_24, %c0_25] : memref<1x8x128xf32, #tpu.memory_space<vmem>>, vector<1x8x128xf32>
    %43 = vector.shape_cast %42 : vector<1x8x128xf32> to vector<8x128xf32>
    %44 = arith.addf %43, %29 : vector<8x128xf32>
    %c0_26 = arith.constant 0 : index
    %c0_27 = arith.constant 0 : index
    %c0_28 = arith.constant 0 : index
    %45 = vector.load %arg6[%c0_26, %c0_27, %c0_28] : memref<1x8x128xf32, #tpu.memory_space<vmem>>, vector<1x8x128xf32>
    %46 = vector.shape_cast %45 : vector<1x8x128xf32> to vector<8x128xf32>
    %47 = vector.shape_cast %44 : vector<8x128xf32> to vector<1x8x128xf32>
    tpu.vector_store %arg6[%c0_26, %c0_27, %c0_28], %47 {strides = array<i32>} : memref<1x8x128xf32, #tpu.memory_space<vmem>>, vector<1x8x128xf32>,
    return
  }
  func.func @transform_0(%arg0: i32, %arg1: i32) -> (i32, i32) {
    %c1_i32 = arith.constant 1 : i32
    %0 = arith.muli %arg0, %c1_i32 : i32
    %1 = arith.addi %0, %arg1 : i32
    %c0_i32 = arith.constant 0 : i32
    %2 = arith.minsi %1, %c0_i32 : i32
    %c0_i32_0 = arith.constant 0 : i32
    %c0_i32_1 = arith.constant 0 : i32
    return %2, %c0_i32_0 : i32, i32
  }
  func.func @transform_1(%arg0: i32, %arg1: i32) -> (i32, i32) {
    %c1_i32 = arith.constant 1 : i32
    %0 = arith.muli %arg0, %c1_i32 : i32
    %1 = arith.addi %0, %arg1 : i32
    %c0_i32 = arith.constant 0 : i32
    %2 = arith.minsi %1, %c0_i32 : i32
    %c0_i32_0 = arith.constant 0 : i32
    %c0_i32_1 = arith.constant 0 : i32
    return %2, %c0_i32_0 : i32, i32
  }
  func.func @transform_2(%arg0: i32, %arg1: i32) -> (i32, i32, i32) {
    %c0_i32 = arith.constant 0 : i32
    %c0_i32_0 = arith.constant 0 : i32
    %c0_i32_1 = arith.constant 0 : i32
    return %arg0, %c0_i32, %c0_i32_0 : i32, i32, i32
  }
  func.func @transform_3(%arg0: i32, %arg1: i32) -> (i32, i32, i32) {
    %c0_i32 = arith.constant 0 : i32
    %c0_i32_0 = arith.constant 0 : i32
    %c0_i32_1 = arith.constant 0 : i32
    return %arg0, %c0_i32, %c0_i32_0 : i32, i32, i32
  }
  func.func @transform_4(%arg0: i32, %arg1: i32) -> (i32, i32, i32) {
    %c0_i32 = arith.constant 0 : i32
    %c0_i32_0 = arith.constant 0 : i32
    %c0_i32_1 = arith.constant 0 : i32
    return %arg0, %c0_i32, %c0_i32_0 : i32, i32, i32
  }
}

</mosaic_0001>

<bundles_post_ra>
// kernel: tpu_custom_call.1
= control target key start
LH: loop header
LB: loop body
LE: loop exit
PB: predicated region body
PF: predicated region fallthrough
CT: control target
= control target key end

     0   :  { %10 = vsyncpa [#allocation3], 0  ;;  %s334_s0 = inlined_call_operand.hbm [shape: f32[16,128], index: 0, kind: input, shape index: {}]   ;;  %s335_s1 = inlined_call_operand.hbm [shape: f32[16,128], index: 1, kind: input, shape index: {}]   ;;  %s336_s2 = inlined_call_operand.hbm [shape: f32[1,8,128], index: 2, kind: output, shape index: {0}]   ;;  %s337_s3 = inlined_call_operand.hbm [shape: f32[1,8,128], index: 3, kind: output, shape index: {1}]   ;;  %s338_s4 = inlined_call_operand.hbm [shape: f32[1,8,128], index: 4, kind: output, shape index: {2}]  }
   0x1   :  { %11 = vsyncpa [#allocation6], 0 }
   0x2   :  { %12 = vsyncpa [#allocation4], 0 }
   0x3   :  { %13 = vsyncpa [#allocation9], 0  ;;  %s287_s15 = smov [#allocation2]  }
   0x4   :  { %s25_s16 = sshll.u32 %s287_s15, 4  ;;  %s26_s16 = int_to_ptr.vmem [resolvable:$true] %s25_s16 }
   0x5   :  { %s187_s17 = scalar_lea.vmem %s26_s16, 256  ;;  %p192_p1 = scmp.lt.s32.totalorder %s26_s16, %s26_s16 }
   0x6   :  { %p188_p0 = scmp.ne.s32.totalorder %s26_s16, %s187_s17  ;;  %p193_p2 = scmp.lt.s32.totalorder %s187_s17, %s187_s17 }
   0x8   :  { %p194_p3 = por %p193_p2, %p192_p1 }
   0xa   :  { %p195_p4 = pnand %p194_p3, %p188_p0 }
   0xc   :  { %198 = shalt.err (!%p195_p4)
}
   0xd   :  { %s288_s18 = smov 128   ;;  %s289_s19 = smov 8  }
   0xe   :  { %31 = dma.hbm_to_vmem [thread:$0]  %s334_s0, 256, %s26_s16, [#allocation3], %s288_s18, %s288_s18, %s289_s19  }
   0xf   :  { %s290_s22 = smov [#allocation5]  }
  0x10   :  { %s43_s23 = sshll.u32 %s290_s22, 4  ;;  %s44_s23 = int_to_ptr.vmem [resolvable:$true] %s43_s23 }
  0x11   :  { %s207_s24 = scalar_lea.vmem %s44_s23, 256  ;;  %p212_p6 = scmp.lt.s32.totalorder %s44_s23, %s44_s23 }
  0x12   :  { %p208_p5 = scmp.ne.s32.totalorder %s44_s23, %s207_s24  ;;  %p213_p7 = scmp.lt.s32.totalorder %s207_s24, %s207_s24 }
  0x14   :  { %p214_p8 = por %p213_p7, %p212_p6 }
  0x16   :  { %p215_p9 = pnand %p214_p8, %p208_p5 }
  0x18   :  { %218 = shalt.err (!%p215_p9)
}
  0x19   :  { %49 = dma.hbm_to_vmem [thread:$0]  %s335_s1, 256, %s44_s23, [#allocation6], %s288_s18, %s288_s18, %s289_s19  }
  0x1a   :  { %279 = dma.done.wait [#allocation3], 256  }
  0x1b   :  { %280 = vsyncadd [#allocation3], 4294967040 }
  0x1c   :  { %281 = dma.done.wait [#allocation6], 256  }
  0x1d   :  { %282 = vsyncadd [#allocation6], 4294967040  ;;  %v71_v0 = vld [vmem:[#allocation2] sm:$0xff]  ;;  %v72_v1 = vld [vmem:[#allocation2 + $0x8] sm:$0xff]  ;;  %s291_s0 = smov [#allocation8]   ;;  %s292_s1 = smov [#allocation10]  }
  0x1e   :  { %v73_v2 = vld [vmem:[#allocation5] sm:$0xff]  ;;  %v74_v3 = vld [vmem:[#allocation5 + $0x8] sm:$0xff]  ;;  %171 = vlog2.f32 %v71_v0  ;;  %v81_v5 = vsub.f32 1.0, %v71_v0  ;;  %v82_v6 = vsub.f32 1.0, %v72_v1  ;;  %s132_s27 = sshll.u32 %s291_s0, 4  ;;  %s142_s28 = sshll.u32 %s292_s1, 4  ;;  %s133_s27 = int_to_ptr.vmem [resolvable:$true] %s132_s27  ;;  %s143_s28 = int_to_ptr.vmem [resolvable:$true] %s142_s28 }
  0x1f   :  { %v97_v4 = vmul.f32 %v73_v2, %v71_v0  ;;  %173 = vlog2.f32 %v72_v1  ;;  %v98_v7 = vmul.f32 %v74_v3, %v72_v1  ;;  %v99_v8 = vadd.f32 %v73_v2, %v71_v0  ;;  %s219_s29 = scalar_lea.vmem %s133_s27, 128  ;;  %p224_p11 = scmp.lt.s32.totalorder %s133_s27, %s133_s27 }
  0x20   :  { %v100_v9 = vadd.f32 %v74_v3, %v72_v1  ;;  %175 = vlog2.f32 %v81_v5  ;;  %p220_p10 = scmp.ne.s32.totalorder %s133_s27, %s219_s29  ;;  %p225_p12 = scmp.lt.s32.totalorder %s219_s29, %s219_s29 }
  0x21   :  { %v102_v10 = vadd.f32 %v98_v7, %v97_v4  ;;  %177 = vlog2.f32 %v82_v6 }
  0x22   :  { %v103_v11 = vadd.f32 %v100_v9, %v99_v8  ;;  %p226_p13 = por %p225_p12, %p224_p11 }
  0x23   :  { %112 = vst [vmem:[#allocation8] sm:$0xff] %v102_v10 }
  0x24   :  { %115 = vst [vmem:[#allocation10] sm:$0xff] %v103_v11  ;;  %p227_p0 = pnand %p226_p13, %p220_p10 }
  0x26   :  { %230 = shalt.err (!%p227_p0)
}
  0x27   :  { %135 = dma.vmem_to_hbm [thread:$0]  %s133_s27, 128, %s337_s3, [#allocation9]  }
  0x28   :  { %s239_s6 = scalar_lea.vmem %s143_s28, 128  ;;  %p244_p2 = scmp.lt.s32.totalorder %s143_s28, %s143_s28 }
  0x29   :  { %p240_p1 = scmp.ne.s32.totalorder %s143_s28, %s239_s6  ;;  %p245_p3 = scmp.lt.s32.totalorder %s239_s6, %s239_s6 }
  0x2b   :  { %p246_p4 = por %p245_p3, %p244_p2 }
  0x2d   :  { %p247_p5 = pnand %p246_p4, %p240_p1 }
  0x2f   :  { %250 = shalt.err (!%p247_p5)
}
  0x30   :  { %145 = dma.vmem_to_hbm [thread:$0]  %s143_s28, 128, %s338_s4, [#allocation9]   ;;  %v172_v12 = vpop.eup %171 }
  0x31   :  { %v174_v13 = vpop.eup %173  ;;  %v76_v14 = vmul.f32 0.6931472, %v172_v12  ;;  %s293_s3 = smov [#allocation7]  }
  0x32   :  { %v176_v15 = vpop.eup %175  ;;  %v78_v16 = vmul.f32 0.6931472, %v174_v13  ;;  %s122_s4 = sshll.u32 %s293_s3, 4  ;;  %s123_s4 = int_to_ptr.vmem [resolvable:$true] %s122_s4 }
  0x33   :  { %v178_v17 = vpop.eup %177  ;;  %v79_v18 = vmax.f32 %v76_v14, -100.0  ;;  %v84_v19 = vmul.f32 0.6931472, %v176_v15  ;;  %s259_s9 = scalar_lea.vmem %s123_s4, 128  ;;  %p264_p7 = scmp.lt.s32.totalorder %s123_s4, %s123_s4 }
  0x34   :  { %v80_v20 = vmax.f32 %v78_v16, -100.0  ;;  %v86_v21 = vmul.f32 0.6931472, %v178_v17  ;;  %p260_p6 = scmp.ne.s32.totalorder %s123_s4, %s259_s9  ;;  %p265_p8 = scmp.lt.s32.totalorder %s259_s9, %s259_s9 }
  0x35   :  { %v87_v22 = vmax.f32 %v84_v19, -100.0 }
  0x36   :  { %v88_v23 = vmax.f32 %v86_v21, -100.0  ;;  %p266_p9 = por %p265_p8, %p264_p7 }
  0x37   :  { %v89_v24 = vsub.f32 %v79_v18, %v87_v22 }
  0x38   :  { %v90_v25 = vsub.f32 %v80_v20, %v88_v23  ;;  %p267_p10 = pnand %p266_p9, %p260_p6 }
  0x39   :  { %v91_v26 = vmul.f32 %v89_v24, %v73_v2 }
  0x3a   :  { %v92_v27 = vmul.f32 %v90_v25, %v74_v3 }
  0x3b   :  { %v93_v28 = vadd.f32 %v91_v26, %v87_v22 }
  0x3c   :  { %v94_v29 = vadd.f32 %v92_v27, %v88_v23 }
  0x3d   :  { %v95_v30 = vsub.f32 0.0, %v93_v28 }
  0x3e   :  { %v96_v31 = vsub.f32 0.0, %v94_v29 }
  0x40   :  { %v101_v32 = vadd.f32 %v96_v31, %v95_v30 }
  0x42   :  { %109 = vst [vmem:[#allocation7] sm:$0xff] %v101_v32 }
  0x43   :  { %270 = shalt.err (!%p267_p10)
}
  0x44   :  { %125 = dma.vmem_to_hbm [thread:$0]  %s123_s4, 128, %s336_s2, [#allocation4]  }
  0x45   :  { %283 = dma.done.wait [#allocation4], 128  }
  0x46   :  { %284 = vsyncadd [#allocation4], 4294967168 }
  0x47   :  { %285 = dma.done.wait [#allocation9], 256  }
  0x48   :  { %286 = vsyncadd [#allocation9], 4294967040 }
  0x49   :  { %155 = vsyncpa [#allocation3], 1 }
  0x4a   :  { %156 = vsyncpa [#allocation6], 1 }
  0x4b   :  { %157 = vsyncpa [#allocation4], 1 }
  0x4c   :  { %158 = vsyncpa [#allocation9], 1 }

</bundles_post_ra>
